<compile_context>
chip_gen: v5e
topology: v5e:2x2
jax: 0.10.0
libtpu: 0.0.40
codegen_flags: <defaults>
</compile_context>

<pallas_src>
import functools

import jax
import jax.numpy as jnp
from jax.experimental import pallas as pl
from jax.experimental.pallas import tpu as pltpu


def _round_width(width, multiplier, min_width=8, divisor=8):
    if not multiplier:
        return width
    width *= multiplier
    min_width = min_width or divisor
    width_out = max(min_width, int(width + divisor / 2) // divisor * divisor)
    if width_out < 0.9 * width:
        width_out += divisor
    return int(width_out)


def _round_up(x, m):
    return (x + m - 1) // m * m


_TARGET_BLOCK_BYTES = 8 * 2**20


# ---------------------------------------------------------------------------
# Generation-aware VMEM budgets (v5e/v6e: 128 MiB, v7x: 64 MiB per TC).
# ---------------------------------------------------------------------------
@functools.lru_cache(maxsize=None)
def _vmem_capacity_bytes():
    try:
        cap = getattr(pltpu.get_tpu_info(), "vmem_capacity_bytes", None)
        if cap:
            return int(cap)
    except Exception:
        pass
    try:
        kind = jax.devices()[0].device_kind.lower()
        if "v5" in kind or "v6" in kind:
            return 128 * 2**20
    except Exception:
        pass
    return 64 * 2**20  # conservative: assume the smallest (v7x per-TC)


@functools.lru_cache(maxsize=None)
def _budgets():
    cap = _vmem_capacity_bytes()
    if cap >= 128 * 2**20:  # v5e / v6e
        return {"fused": 100 * 2**20, "tile": 48 * 2**20, "limit_cap": 112 * 2**20}
    # v7x: 64 MiB per TC -> leave >= 8 MiB headroom for Mosaic scratch/temps
    return {"fused": 40 * 2**20, "tile": 24 * 2**20, "limit_cap": 52 * 2**20}


def _choose_n_blk(N, per_row_bytes, fused_budget, weight_bytes):
    """Largest n_blk that (a) divides N (no batch pad / imbalance), (b) keeps
    double-buffered in+out blocks inside the budget, (c) keeps blocks in the
    ~2-8 MiB sweet spot, (d) leaves >= 4 grid steps (>= 2 per TC on v7x) when
    N allows it.  Prefer an even grid-step count for megacore balance."""
    cap = (fused_budget - 2 * weight_bytes) // (4 * per_row_bytes)
    cap = min(cap, max(1, _TARGET_BLOCK_BYTES // per_row_bytes), N)
    if N >= 4:
        cap = min(cap, N // 4)
    elif N >= 2:
        cap = min(cap, N // 2)
    cap = max(1, cap)
    divisors = [d for d in range(1, cap + 1) if N % d == 0]
    even = [d for d in divisors if (N // d) % 2 == 0]
    return max(even) if even else max(divisors)


# ---------------------------------------------------------------------------
# Fused single-pass kernel: squeeze + excitation + scale for n_blk batch rows
# whose whole (C, S) slab is resident in VMEM.
# ---------------------------------------------------------------------------
def _se_fused_kernel(x_ref, w1_ref, b1_ref, w2_ref, b2_ref, o_ref,
                     *, inv_s, fc_on_vpu):
    x = x_ref[...]                                        # (Nb, C, S)
    # Squeeze: f32 accumulation without materializing an f32 copy of the block.
    s = jnp.sum(x, axis=2, dtype=jnp.float32) * inv_s     # (Nb, C)
    if fc_on_vpu:
        # Tiny FCs on the VPU (weights pre-transposed: (F, C) and (C, F)).
        h = jnp.sum(s[:, None, :] * w1_ref[...][None, :, :], axis=-1) + b1_ref[...]
        h = jnp.maximum(h, 0.0)                           # (Nb, F)
        z = jnp.sum(h[:, None, :] * w2_ref[...][None, :, :], axis=-1) + b2_ref[...]
    else:
        h = jnp.dot(s, w1_ref[...], preferred_element_type=jnp.float32) + b1_ref[...]
        h = jnp.maximum(h, 0.0)
        z = jnp.dot(h, w2_ref[...], preferred_element_type=jnp.float32) + b2_ref[...]
    z = jax.nn.sigmoid(z)                                 # (Nb, C)
    o_ref[...] = (x * z.astype(x.dtype)[:, :, None]).astype(o_ref.dtype)


def _se_fused(x_flat, w1, b1, w2, b2, per_row_bytes, weight_bytes, fc_on_mxu,
              budgets):
    N, C, S = x_flat.shape
    F = w1.shape[1]
    itemsize = jnp.dtype(x_flat.dtype).itemsize

    n_blk = _choose_n_blk(N, per_row_bytes, budgets["fused"], weight_bytes)
    grid = (N // n_blk,)

    # VPU excitation only when the broadcast (Nb, F, C) intermediate is tiny;
    # otherwise use the (otherwise idle) MXU and avoid the VMEM/vreg pressure.
    fc_on_vpu = (not fc_on_mxu) and C <= 128 and F <= 128 \
        and n_blk * C * F * 4 <= 2**20
    wa, wb = (w1.T, w2.T) if fc_on_vpu else (w1, w2)

    needed = 4 * n_blk * per_row_bytes + 2 * weight_bytes + 4 * 2**20
    vmem_limit = int(max(32 * 2**20, min(budgets["limit_cap"], needed)))

    kernel = functools.partial(_se_fused_kernel, inv_s=1.0 / float(S),
                               fc_on_vpu=fc_on_vpu)
    cost = pl.CostEstimate(
        flops=int(2 * N * C * S + 4 * N * C * F),
        transcendentals=int(N * C),
        bytes_accessed=int(2 * N * C * S * itemsize + weight_bytes))

    return pl.pallas_call(
        kernel,
        out_shape=jax.ShapeDtypeStruct((N, C, S), x_flat.dtype),
        grid_spec=pltpu.PrefetchScalarGridSpec(
            num_scalar_prefetch=0,
            grid=grid,
            in_specs=[
                pl.BlockSpec((n_blk, C, S), lambda b: (b, 0, 0)),   # x
                pl.BlockSpec(wa.shape, lambda b: (0, 0)),           # w1(T)
                pl.BlockSpec(b1.shape, lambda b: (0, 0)),           # b1
                pl.BlockSpec(wb.shape, lambda b: (0, 0)),           # w2(T)
                pl.BlockSpec(b2.shape, lambda b: (0, 0)),           # b2
            ],
            out_specs=pl.BlockSpec((n_blk, C, S), lambda b: (b, 0, 0)),
        ),
        compiler_params=pltpu.CompilerParams(
            dimension_semantics=("parallel",),
            vmem_limit_bytes=vmem_limit),
        cost_estimate=cost,
    )(x_flat, wa, b1, wb, b2)


# ---------------------------------------------------------------------------
# Two-pass fallback when a per-batch (C, S) slab does not fit VMEM:
#   pass 1: tiled spatial-sum kernel -> (N, C, 1) sums
#   (tiny FC + sigmoid in plain JAX)
#   pass 2: tiled broadcast-scale kernel (both grid axes parallel)
# No spatial re-padding: partial tail tiles are masked.
# ---------------------------------------------------------------------------
def _sum_pool_kernel(x_ref, o_ref, acc_ref, *, true_s, st, mask_tail):
    j = pl.program_id(1)

    @pl.when(j == 0)
    def _():
        acc_ref[...] = jnp.zeros_like(acc_ref)

    x = x_ref[...]
    if mask_tail:
        lane = jax.lax.broadcasted_iota(jnp.int32, x.shape, dimension=2) + j * st
        x = jnp.where(lane < true_s, x, jnp.zeros_like(x))
    acc_ref[...] += jnp.sum(x, axis=2, keepdims=True, dtype=jnp.float32)

    @pl.when(j == pl.num_programs(1) - 1)
    def _():
        o_ref[...] = acc_ref[...]


def _scale_kernel(x_ref, z_ref, o_ref):
    o_ref[...] = (x_ref[...] * z_ref[...].astype(x_ref.dtype)).astype(o_ref.dtype)


def _se_two_pass(x_flat, w1, b1, w2, b2, budgets, max_st=None):
    N, C, S = x_flat.shape
    itemsize = jnp.dtype(x_flat.dtype).itemsize

    # Lane-dense spatial tile: a few MiB, multiple of 128 (or the full S).
    per_strip = C * 128 * itemsize
    target = min(_TARGET_BLOCK_BYTES // 2, budgets["tile"] // 4)
    st = 128 * max(1, target // per_strip)
    if max_st is not None:
        st = min(st, int(max_st))
    if st >= S:
        st = S                       # full-extent last dim is always legal
    grid = (N, pl.cdiv(S, st))
    mask_tail = (S % st) != 0        # partial tail tile -> mask the reduce

    block_bytes = C * st * itemsize
    vmem_limit = int(max(32 * 2**20,
                         min(budgets["limit_cap"], 4 * block_bytes + 4 * 2**20)))

    sum_cost = pl.CostEstimate(flops=int(N * C * S), transcendentals=0,
                               bytes_accessed=int(N * C * S * itemsize))
    sums = pl.pallas_call(
        functools.partial(_sum_pool_kernel, true_s=S, st=st, mask_tail=mask_tail),
        out_shape=jax.ShapeDtypeStruct((N, C, 1), jnp.float32),
        grid_spec=pltpu.PrefetchScalarGridSpec(
            num_scalar_prefetch=0,
            grid=grid,
            in_specs=[pl.BlockSpec((1, C, st), lambda i, j: (i, 0, j))],
            out_specs=pl.BlockSpec((1, C, 1), lambda i, j: (i, 0, 0)),
            scratch_shapes=[pltpu.VMEM((1, C, 1), jnp.float32)],
        ),
        compiler_params=pltpu.CompilerParams(
            dimension_semantics=("parallel", "arbitrary"),
            vmem_limit_bytes=vmem_limit),
        cost_estimate=sum_cost,
    )(x_flat)

    # Excitation is a few hundred FLOPs: plain JAX between the two passes.
    s = sums[:, :, 0] * (1.0 / float(S))                  # (N, C)
    h = jnp.maximum(jnp.dot(s, w1) + b1, 0.0)             # (N, F)
    z = jax.nn.sigmoid(jnp.dot(h, w2) + b2)               # (N, C)
    z = z[:, :, None].astype(jnp.float32)                 # (N, C, 1)

    scale_cost = pl.CostEstimate(flops=int(N * C * S), transcendentals=0,
                                 bytes_accessed=int(2 * N * C * S * itemsize))
    return pl.pallas_call(
        _scale_kernel,
        out_shape=jax.ShapeDtypeStruct((N, C, S), x_flat.dtype),
        grid_spec=pltpu.PrefetchScalarGridSpec(
            num_scalar_prefetch=0,
            grid=grid,
            in_specs=[
                pl.BlockSpec((1, C, st), lambda i, j: (i, 0, j)),
                pl.BlockSpec((1, C, 1), lambda i, j: (i, 0, 0)),
            ],
            out_specs=pl.BlockSpec((1, C, st), lambda i, j: (i, 0, j)),
        ),
        compiler_params=pltpu.CompilerParams(
            dimension_semantics=("parallel", "parallel"),
            vmem_limit_bytes=vmem_limit),
        cost_estimate=scale_cost,
    )(x_flat, z)


# ---------------------------------------------------------------------------
# Public wrapper
# ---------------------------------------------------------------------------
@functools.partial(jax.jit,
                   static_argnames=("force_two_pass", "fc_on_mxu", "two_pass_max_st"))
def se_forward(x, w1, b1, w2, b2, *, force_two_pass=False, fc_on_mxu=False,
               two_pass_max_st=None):
    """x: (N, C, T, H, W). w1: (C, F), b1: (1, F), w2: (F, C), b2: (1, C)."""
    N, C, T, H, W = x.shape
    S = T * H * W
    itemsize = jnp.dtype(x.dtype).itemsize
    budgets = _budgets()

    # Flatten (T,H,W) -> S.  No spatial / batch padding: full-extent last dims
    # are exempt from the (8,128) BlockSpec rule, and masked tail stores are
    # far cheaper than extra HBM pad/slice passes.
    x_flat = x.reshape(N, C, S)

    per_row_bytes = C * S * itemsize
    weight_bytes = int(sum(a.size * jnp.dtype(a.dtype).itemsize
                           for a in (w1, b1, w2, b2)))

    fused_fits = 4 * per_row_bytes + 2 * weight_bytes <= budgets["fused"]
    if fused_fits and not force_two_pass:
        out_flat = _se_fused(x_flat, w1, b1, w2, b2, per_row_bytes, weight_bytes,
                             fc_on_mxu, budgets)
    else:
        out_flat = _se_two_pass(x_flat, w1, b1, w2, b2, budgets,
                                max_st=two_pass_max_st)

    return out_flat.reshape(N, C, T, H, W)


def se_reference(x, w1, b1, w2, b2):
    """Plain-JAX reference matching the PyTorch forward."""
    s = jnp.mean(x, axis=(2, 3, 4))                       # (N, C)
    h = jnp.maximum(s @ w1 + b1, 0.0)                     # (N, F)
    z = jax.nn.sigmoid(h @ w2 + b2)                       # (N, C)
    return x * z[:, :, None, None, None]


if __name__ == "__main__":
    def run_case(N, C, T, H, W, ratio, key, **kwargs):
        dim_fc = _round_width(C, ratio)
        kx, kw1, kb1, kw2, kb2 = jax.random.split(key, 5)
        x = jax.random.normal(kx, (N, C, T, H, W), dtype=jnp.float32)
        # PyTorch fc1.weight is (dim_fc, C, 1, 1, 1); stored transposed as
        # (C, dim_fc) so the excitation is s @ w1 (row-vector convention).
        w1 = jax.random.normal(kw1, (C, dim_fc), dtype=jnp.float32) * 0.1
        b1 = jax.random.normal(kb1, (1, dim_fc), dtype=jnp.float32) * 0.1
        w2 = jax.random.normal(kw2, (dim_fc, C), dtype=jnp.float32) * 0.1
        b2 = jax.random.normal(kb2, (1, C), dtype=jnp.float32) * 0.1

        out = se_forward(x, w1, b1, w2, b2, **kwargs)
        jax.block_until_ready(out)
        ref = se_reference(x, w1, b1, w2, b2)
        assert out.shape == x.shape
        assert jnp.allclose(out, ref, atol=1e-5, rtol=1e-5), \
            f"mismatch vs reference for case {(N, C, T, H, W, ratio, kwargs)}"

    key = jax.random.PRNGKey(0)
    k1, k2, k3, k4, k5 = jax.random.split(key, 5)
    # Fused path, S a multiple of 128, VPU excitation, even parallel grid.
    run_case(2, 16, 4, 8, 8, 0.25, k1)
    # Fused path, S = 98 (not a multiple of 128 -> masked tail stores), N = 3.
    run_case(3, 16, 2, 7, 7, 0.5, k2)
    # Two-pass fallback: single full-S spatial tile.
    run_case(2, 16, 4, 8, 8, 0.25, k3, force_two_pass=True)
    # Two-pass fallback with a partial spatial tail tile (masked reduce).
    run_case(2, 8, 5, 7, 7, 0.25, k4, force_two_pass=True, two_pass_max_st=128)
    # Fused path with the batched-MXU excitation branch.
    run_case(2, 16, 4, 8, 8, 0.25, k5, fc_on_mxu=True)

    print("KERNEL_OK")
</pallas_src>

<mosaic_0001>
module attributes {stable_mosaic.version = 11 : i64} {
  func.func @_se_fused_kernel(%arg0: i32, %arg1: memref<1x16x256xf32, #tpu.memory_space<vmem>>, %arg2: memref<8x16xf32, #tpu.memory_space<vmem>>, %arg3: memref<1x8xf32, #tpu.memory_space<vmem>>, %arg4: memref<16x8xf32, #tpu.memory_space<vmem>>, %arg5: memref<1x16xf32, #tpu.memory_space<vmem>>, %arg6: memref<1x16x256xf32, #tpu.memory_space<vmem>>) attributes {dimension_semantics = [#tpu.dimension_semantics<parallel>], iteration_bounds = array<i64: 2>, scalar_prefetch = 0 : i64, scratch_operands = 0 : i64, tpu.core_type = #tpu.core_type<tc>, window_params = [{transform_indices = @transform_0, window_bounds = array<i64: 1, 16, 256>}, {pipeline_mode = #tpu.pipeline_mode<synchronous>, transform_indices = @transform_1, window_bounds = array<i64: 8, 16>}, {pipeline_mode = #tpu.pipeline_mode<synchronous>, transform_indices = @transform_2, window_bounds = array<i64: 1, 8>}, {pipeline_mode = #tpu.pipeline_mode<synchronous>, transform_indices = @transform_3, window_bounds = array<i64: 16, 8>}, {pipeline_mode = #tpu.pipeline_mode<synchronous>, transform_indices = @transform_4, window_bounds = array<i64: 1, 16>}, {transform_indices = @transform_5, window_bounds = array<i64: 1, 16, 256>}]} {
    %c0 = arith.constant 0 : index
    %c0_0 = arith.constant 0 : index
    %c0_1 = arith.constant 0 : index
    %0 = vector.load %arg1[%c0, %c0_0, %c0_1] : memref<1x16x256xf32, #tpu.memory_space<vmem>>, vector<1x16x256xf32>
    %cst = arith.constant dense<0.000000e+00> : vector<1x16xf32>
    %1 = vector.multi_reduction <add>, %0, %cst [2] : vector<1x16x256xf32> to vector<1x16xf32>
    %cst_2 = arith.constant 3.906250e-03 : f32
    %2 = vector.broadcast %cst_2 : f32 to vector<1x16xf32>
    %3 = arith.mulf %1, %2 : vector<1x16xf32>
    %4 = vector.shape_cast %3 : vector<1x16xf32> to vector<1x1x16xf32>
    %c0_3 = arith.constant 0 : index
    %c0_4 = arith.constant 0 : index
    %5 = vector.load %arg2[%c0_3, %c0_4] : memref<8x16xf32, #tpu.memory_space<vmem>>, vector<8x16xf32>
    %6 = vector.shape_cast %5 : vector<8x16xf32> to vector<1x8x16xf32>
    %7 = vector.broadcast %4 : vector<1x1x16xf32> to vector<1x8x16xf32>
    %8 = arith.mulf %7, %6 : vector<1x8x16xf32>
    %cst_5 = arith.constant dense<0.000000e+00> : vector<1x8xf32>
    %9 = vector.multi_reduction <add>, %8, %cst_5 [2] : vector<1x8x16xf32> to vector<1x8xf32>
    %c0_6 = arith.constant 0 : index
    %c0_7 = arith.constant 0 : index
    %10 = vector.load %arg3[%c0_6, %c0_7] : memref<1x8xf32, #tpu.memory_space<vmem>>, vector<1x8xf32>
    %11 = arith.addf %9, %10 : vector<1x8xf32>
    %cst_8 = arith.constant 0.000000e+00 : f32
    %12 = vector.broadcast %cst_8 : f32 to vector<1x8xf32>
    %13 = arith.maximumf %11, %12 : vector<1x8xf32>
    %14 = vector.shape_cast %13 : vector<1x8xf32> to vector<1x1x8xf32>
    %c0_9 = arith.constant 0 : index
    %c0_10 = arith.constant 0 : index
    %15 = vector.load %arg4[%c0_9, %c0_10] : memref<16x8xf32, #tpu.memory_space<vmem>>, vector<16x8xf32>
    %16 = vector.shape_cast %15 : vector<16x8xf32> to vector<1x16x8xf32>
    %17 = vector.broadcast %14 : vector<1x1x8xf32> to vector<1x16x8xf32>
    %18 = arith.mulf %17, %16 : vector<1x16x8xf32>
    %cst_11 = arith.constant dense<0.000000e+00> : vector<1x16xf32>
    %19 = vector.multi_reduction <add>, %18, %cst_11 [2] : vector<1x16x8xf32> to vector<1x16xf32>
    %c0_12 = arith.constant 0 : index
    %c0_13 = arith.constant 0 : index
    %20 = vector.load %arg5[%c0_12, %c0_13] : memref<1x16xf32, #tpu.memory_space<vmem>>, vector<1x16xf32>
    %21 = arith.addf %19, %20 : vector<1x16xf32>
    %22 = arith.negf %21 : vector<1x16xf32>
    %23 = math.exp %22 : vector<1x16xf32>
    %cst_14 = arith.constant 1.000000e+00 : f32
    %24 = vector.broadcast %cst_14 : f32 to vector<1x16xf32>
    %25 = arith.addf %24, %23 : vector<1x16xf32>
    %26 = arith.divf %24, %25 : vector<1x16xf32>
    %27 = vector.shape_cast %26 : vector<1x16xf32> to vector<1x16x1xf32>
    %28 = vector.broadcast %27 : vector<1x16x1xf32> to vector<1x16x256xf32>
    %29 = arith.mulf %0, %28 : vector<1x16x256xf32>
    %c0_15 = arith.constant 0 : index
    %c0_16 = arith.constant 0 : index
    %c0_17 = arith.constant 0 : index
    %30 = vector.load %arg6[%c0_15, %c0_16, %c0_17] : memref<1x16x256xf32, #tpu.memory_space<vmem>>, vector<1x16x256xf32>
    tpu.vector_store %arg6[%c0_15, %c0_16, %c0_17], %29 {strides = array<i32>} : memref<1x16x256xf32, #tpu.memory_space<vmem>>, vector<1x16x256xf32>,
    return
  }
  func.func @transform_0(%arg0: i32) -> (i32, i32, i32) {
    %c0_i32 = arith.constant 0 : i32
    %c0_i32_0 = arith.constant 0 : i32
    %c0_i32_1 = arith.constant 0 : i32
    return %arg0, %c0_i32, %c0_i32_0 : i32, i32, i32
  }
  func.func @transform_1(%arg0: i32) -> (i32, i32) {
    %c0_i32 = arith.constant 0 : i32
    %c0_i32_0 = arith.constant 0 : i32
    %c0_i32_1 = arith.constant 0 : i32
    return %c0_i32, %c0_i32_0 : i32, i32
  }
  func.func @transform_2(%arg0: i32) -> (i32, i32) {
    %c0_i32 = arith.constant 0 : i32
    %c0_i32_0 = arith.constant 0 : i32
    %c0_i32_1 = arith.constant 0 : i32
    return %c0_i32, %c0_i32_0 : i32, i32
  }
  func.func @transform_3(%arg0: i32) -> (i32, i32) {
    %c0_i32 = arith.constant 0 : i32
    %c0_i32_0 = arith.constant 0 : i32
    %c0_i32_1 = arith.constant 0 : i32
    return %c0_i32, %c0_i32_0 : i32, i32
  }
  func.func @transform_4(%arg0: i32) -> (i32, i32) {
    %c0_i32 = arith.constant 0 : i32
    %c0_i32_0 = arith.constant 0 : i32
    %c0_i32_1 = arith.constant 0 : i32
    return %c0_i32, %c0_i32_0 : i32, i32
  }
  func.func @transform_5(%arg0: i32) -> (i32, i32, i32) {
    %c0_i32 = arith.constant 0 : i32
    %c0_i32_0 = arith.constant 0 : i32
    %c0_i32_1 = arith.constant 0 : i32
    return %arg0, %c0_i32, %c0_i32_0 : i32, i32, i32
  }
}

</mosaic_0001>

<bundles_post_ra>
// kernel: se_forward.1
= control target key start
LH: loop header
LB: loop body
LE: loop exit
PB: predicated region body
PF: predicated region fallthrough
CT: control target
= control target key end

     0   :  { %s971_s18 = smov 0   ;;  %s1133_s0 = inlined_call_operand.vmem [shape: f32[2,16,256], index: 0, kind: input, shape index: {}]   ;;  %s1134_s1 = inlined_call_operand.vmem [shape: f32[8,16], index: 1, kind: input, shape index: {}]   ;;  %s1135_s2 = inlined_call_operand.vmem [shape: f32[1,8], index: 2, kind: input, shape index: {}]   ;;  %s1136_s3 = inlined_call_operand.vmem [shape: f32[16,8], index: 3, kind: input, shape index: {}]   ;;  %s1137_s4 = inlined_call_operand.vmem [shape: f32[1,16], index: 4, kind: input, shape index: {}]   ;;  %s1138_s5 = inlined_call_operand.vmem [shape: f32[2,16,256], index: 5, kind: output, shape index: {}]  }
   0x1 LB: > { %s879_s19 = sadd.s32 4294967295, %s938_s18   ;;  %p883_p0 = scmp.ge.s32.totalorder %s938_s18, 1  ;;  %s938_s18 = sphi %s971_s18, %s15_s18  }
   0x2   : > { %p187_p1 = scmp.lt.s32.totalorder %s938_s18, 3 }
   0x4   : > { %p188_p2 = pnand %p883_p0, %p187_p1 }
   0x5   : > { %p215_p3 = scmp.lt.s32.totalorder (!%p188_p2), %s879_s19, 1 }
   0x6   : > { %191 = sbr.rel (%p188_p2) target bundleno = 869 (0x365), region = 40 }
   0xb   : > { %v240_v0 = vlaneseq  ;;  %s1140_s19 = smov (!%p215_p3, %s879_s19), 1  ;;  %v237_v3 = vld [vmem:[%s1134_s1] sm:$0xff]  ;;  %v940_v22 = vmov 0   ;;  %v499_v61 = vld [vmem:[%s1136_s3 + $0x8] sm:$0xff]  ;;  %vm444_vm0 = vcmask 130112   ;;  %vm467_vm1 = vcmask 1041409  }
   0xc   : > { %s892_s20 = sshll.u32 %s1140_s19, 5  ;;  %v252_v7 = vperm.slane %v237_v3, 1  ;;  %v239_v8 = vperm.slane %v237_v3, 0  ;;  %v265_v12 = vperm.slane %v237_v3, 2  ;;  %v330_v13 = vperm.slane %v237_v3, 7  ;;  %v1018_v16 = vld [vmem:[%s1136_s3] sm:$0xff] }
   0xd   : > { %v980_v1 = vshrl.u32 %v240_v0, 7  ;;  %s219_s23 = scalar_lea.vmem %s1133_s0, %s892_s20  ;;  %v278_v14 = vperm.slane %v237_v3, 3  ;;  %v291_v15 = vperm.slane %v237_v3, 4  ;;  %v304_v17 = vperm.slane %v237_v3, 5  ;;  %v922_v21 = vld [vmem:[%s1135_s2] ss:$0 sm:$0xff]  ;;  %s224_s11 = scalar_lea.vmem %s1138_s5, %s892_s20 }
   0xe   : > { %v998_v4 = vld [vmem:[%s219_s23] sm:$0xff]  ;;  %v1000_v5 = vld [vmem:[%s219_s23 + $0x8] sm:$0xff]  ;;  %v1005_v9 = vld [vmem:[%s219_s23 + $0x10] sm:$0xff]  ;;  %v502_v18 = vperm.slane %v1018_v16, 0  ;;  %v317_v19 = vperm.slane %v237_v3, 6  ;;  %v523_v20 = vperm.slane %v1018_v16, 3 }
   0xf   : > { %904 = vset.pattern.permute.xlu2 %v980_v1  ;;  %903 = vset.pattern.permute.xlu1 %v980_v1  ;;  %v988_v2 = vadd.s32 8, %v980_v1  ;;  %v229_v6 = vadd.f32 %v1000_v5, %v998_v4  ;;  %v1007_v10 = vld [vmem:[%s219_s23 + $0x18] sm:$0xff]  ;;  %v509_v59 = vperm.slane %v1018_v16, 1  ;;  %v516_v60 = vperm.slane %v1018_v16, 2 }
  0x10   : > { %v232_v11 = vadd.f32 %v1007_v10, %v1005_v9  ;;  %v572_v62 = vperm.slane %v499_v61, 2  ;;  %v530_v63 = vperm.slane %v1018_v16, 4  ;;  %vm469_vm2 = vcmask 1042434  }
  0x11   : > { %908 = vset.pattern.permute.xlu0 %v988_v2  ;;  %vm471_vm3 = vcmask 1043459   ;;  %vm473_vm4 = vcmask 1044484   ;;  %vm475_vm5 = vcmask 1045509   ;;  %vm477_vm6 = vcmask 1046534  }
  0x12   : > { %230 = vadd.xlane.f32.xlu0 %v229_v6  ;;  %v544_v6 = vperm.slane %v1018_v16, 6  ;;  %vm479_vm7 = vcmask 1047559   ;;  %vm482_vm8 = vcmask 130048   ;;  %vm742_vm9 = vcmask 64512  }
  0x17   : > { %257 = vperm.xlu2 %904, %v252_v7   ;;  %244 = vperm.xlu1 %903, %v239_v8  }
  0x1a   : > { %233 = vadd.xlane.f32.xlu0 %v232_v11 }
  0x1f   : > { %906 = vset.pattern.permute.xlu2 %v988_v2  ;;  %905 = vset.pattern.permute.xlu1 %v988_v2 }
  0x27   : > { %263 = vperm.xlu2 %906, %v252_v7   ;;  %250 = vperm.xlu1 %905, %v239_v8   ;;  %v537_v7 = vperm.slane %v1018_v16, 5 }
  0x2e   : > { %341 = vperm.xlu0 %908, %v330_v13  }
  0x2f   : > { %907 = vset.pattern.permute.xlu2 %v980_v1  ;;  %276 = vperm.xlu1 %905, %v265_v12  }
  0x36   : > { %909 = vset.pattern.permute.xlu0 %v980_v1 }
  0x37   : > { %283 = vperm.xlu2 %907, %v278_v14   ;;  %289 = vperm.xlu1 %905, %v278_v14  }
  0x3e   : > { %270 = vperm.xlu0 %909, %v265_v12   ;;  %v565_v12 = vperm.slane %v499_v61, 1 }
  0x3f   : > { %296 = vperm.xlu2 %907, %v291_v15   ;;  %302 = vperm.xlu1 %905, %v291_v15  }
  0x46   : > { %507 = vperm.xlu0 %909, %v502_v18   ;;  %v586_v18 = vperm.slane %v499_v61, 4 }
  0x47   : > { %309 = vperm.xlu2 %907, %v304_v17   ;;  %315 = vperm.xlu1 %905, %v304_v17  }
  0x4e   : > { %528 = vperm.xlu0 %909, %v523_v20  }
  0x4f   : > { %322 = vperm.xlu2 %907, %v317_v19   ;;  %328 = vperm.xlu1 %905, %v317_v19   ;;  %v579_v19 = vperm.slane %v499_v61, 3 }
  0x56   : > { %913 = vset.pattern.permute.xlu0 %v940_v22 }
  0x57   : > { %335 = vperm.xlu2 %907, %v330_v13   ;;  %910 = vset.pattern.permute.xlu1 %v940_v22  ;;  %v558_v13 = vperm.slane %v499_v61, 0 }
  0x5f   : > { %493 = vperm.xlu2 %907, %v922_v21  }
  0x67   : > { %911 = vset.pattern.permute.xlu2 %v940_v22 }
  0x71   : > { %v258_v23 = vpop.permute.xlu2 %257 }
  0x81   : > { %v264_v25 = vpop.permute.xlu2 %263 }
  0x85   : > { %v231_v24 = vpop.xlane.xlu0 %230 }
  0x86   : > { %v235_v26 = vmul.f32 0.00390625, %v231_v24  ;;  %v600_v24 = vperm.slane %v499_v61, 6 }
  0x88   : > { %v361_v31 = vmul.f32 %v258_v23, %v235_v26 }
  0x89   : > { %v245_v27 = vpop.permute.xlu1 %244 }
  0x8a   : > { %v359_v28 = vmul.f32 %v245_v27, %v235_v26 }
  0x8c   : > { %392 = vperm.xlu1 %910, %v359_v28   ;;  %v607_v28 = vperm.slane %v499_v61, 7 }
  0x8d   : > { %v234_v37 = vpop.xlane.xlu0 %233 }
  0x8e   : > { %v236_v39 = vmul.f32 0.00390625, %v234_v37 }
  0x90   : > { %v362_v55 = vmul.f32 %v264_v25, %v236_v39  ;;  %v593_v25 = vperm.slane %v499_v61, 5 }
  0x91   : > { %v284_v29 = vpop.permute.xlu2 %283 }
  0x92   : > { %v365_v30 = vmul.f32 %v284_v29, %v235_v26  ;;  %v551_v29 = vperm.slane %v1018_v16, 7 }
  0x94   : > { %410 = vperm.xlu2 %911, %v365_v30   ;;  %398 = vperm.xlu1 %910, %v361_v31   ;;  %v1052_v31 = vand.u32 127, %v240_v0 }
  0x99   : > { %v297_v32 = vpop.permute.xlu2 %296  ;;  %v251_v33 = vpop.permute.xlu1 %250 }
  0x9a   : > { %v367_v34 = vmul.f32 %v297_v32, %v235_v26  ;;  %v360_v51 = vmul.f32 %v251_v33, %v236_v39 }
  0x9c   : > { %416 = vperm.xlu2 %911, %v367_v34   ;;  %v442_v34 = vadd.s32 4294967288, %v1052_v31 }
  0xa0   : > { %v342_v43 = vpop.permute.xlu0 %341 }
  0xa1   : > { %v310_v35 = vpop.permute.xlu2 %309  ;;  %v277_v36 = vpop.permute.xlu1 %276  ;;  %v374_v58 = vmul.f32 %v342_v43, %v236_v39 }
  0xa2   : > { %v369_v38 = vmul.f32 %v310_v35, %v235_v26  ;;  %v364_v42 = vmul.f32 %v277_v36, %v236_v39 }
  0xa4   : > { %422 = vperm.xlu1 %910, %v369_v38  }
  0xa9   : > { %v323_v40 = vpop.permute.xlu2 %322  ;;  %v290_v41 = vpop.permute.xlu1 %289 }
  0xaa   : > { %v366_v46 = vmul.f32 %v290_v41, %v236_v39  ;;  %v371_v56 = vmul.f32 %v323_v40, %v235_v26 }
  0xac   : > { %407 = vperm.xlu1 %910, %v364_v42  }
  0xb0   : > { %v271_v48 = vpop.permute.xlu0 %270 }
  0xb1   : > { %v336_v44 = vpop.permute.xlu2 %335  ;;  %v303_v45 = vpop.permute.xlu1 %302  ;;  %v363_v49 = vmul.f32 %v271_v48, %v235_v26 }
  0xb2   : > { %v373_v47 = vmul.f32 %v336_v44, %v235_v26  ;;  %v368_v52 = vmul.f32 %v303_v45, %v236_v39 }
  0xb3   : > { %404 = vperm.xlu0 %913, %v363_v49  }
  0xb4   : > { %434 = vperm.xlu2 %911, %v373_v47   ;;  %413 = vperm.xlu1 %910, %v366_v46  }
  0xb8   : > { %v1044_v17 = vpop.permute.xlu0 %507 }
  0xb9   : > { %v316_v50 = vpop.permute.xlu1 %315  ;;  %v1037_v3 = vpop.permute.xlu2 %493 }
  0xba   : > { %v370_v57 = vmul.f32 %v316_v50, %v236_v39 }
  0xbb   : > { %419 = vperm.xlu0 %913, %v368_v52  }
  0xbc   : > { %395 = vperm.xlu2 %911, %v360_v51  }
  0xc0   : > { %v1048_v23 = vpop.permute.xlu0 %528 }
  0xc1   : > { %v329_v53 = vpop.permute.xlu1 %328 }
  0xc2   : > { %v372_v54 = vmul.f32 %v329_v53, %v236_v39 }
  0xc3   : > { %428 = vperm.xlu0 %913, %v371_v56  }
  0xc4   : > { %431 = vperm.xlu1 %910, %v372_v54   ;;  %401 = vperm.xlu2 %911, %v362_v55  }
  0xcb   : > { %437 = vperm.xlu0 %913, %v374_v58  }
  0xcc   : > { %425 = vperm.xlu2 %911, %v370_v57   ;;  %915 = vset.pattern.permute.xlu1 %v980_v1 }
  0xd3   : > { %914 = vset.pattern.permute.xlu0 %v980_v1 }
  0xd4   : > { %912 = vset.pattern.permute.xlu2 %v980_v1  ;;  %577 = vperm.xlu1 %915, %v572_v62  }
  0xdb   : > { %542 = vperm.xlu0 %914, %v537_v7  }
  0xdc   : > { %514 = vperm.xlu2 %912, %v509_v59   ;;  %916 = vset.pattern.permute.xlu1 %v940_v22 }
  0xe3   : > { %563 = vperm.xlu0 %914, %v558_v13  }
  0xe4   : > { %521 = vperm.xlu2 %912, %v516_v60  }
  0xeb   : > { %584 = vperm.xlu0 %914, %v579_v19  }
  0xec   : > { %535 = vperm.xlu2 %912, %v530_v63  }
  0xee   : > { %v1042_v8 = vpop.permute.xlu2 %410 }
  0xef   : > { %v452_v50 = vperm.slane %v1042_v8, %v1052_v31 }
  0xf3   : > { %598 = vperm.xlu0 %914, %v593_v25  }
  0xf4   : > { %549 = vperm.xlu2 %912, %v544_v6  }
  0xf6   : > { %v417_v14 = vpop.permute.xlu2 %416 }
  0xf7   : > { %v455_v47 = vperm.slane %v417_v14, %v1052_v31 }
  0xfb   : > { %556 = vperm.xlu0 %914, %v551_v29  }
  0xfc   : > { %570 = vperm.xlu2 %912, %v565_v12  }
  0xfe   : > { %v393_v11 = vpop.permute.xlu1 %392 }
  0xff   : > { %v441_v0 = vperm.slane %v393_v11, %v1052_v31 }
 0x103   : > { %917 = vset.pattern.permute.xlu0 %v940_v22 }
 0x104   : > { %591 = vperm.xlu2 %912, %v586_v18  }
 0x106   : > { %v399_v15 = vpop.permute.xlu1 %398 }
 0x107   : > { %v446_v16 = vperm.slane %v399_v15, %v1052_v31 }
 0x10c   : > { %605 = vperm.xlu2 %912, %v600_v24  }
 0x10e   : > { %v1046_v20 = vpop.permute.xlu2 %434 }
 0x10f   : > { %v464_v62 = vperm.slane %v1046_v20, %v1052_v31 }
 0x114   : > { %612 = vperm.xlu2 %912, %v607_v28  }
 0x116   : > { %v423_v21 = vpop.permute.xlu1 %422  ;;  %v396_v26 = vpop.permute.xlu2 %395 }
 0x117   : > { %v443_v38 = vperm.slane %v396_v26, %v442_v34  ;;  %v458_v58 = vperm.slane %v423_v21, %v1052_v31 }
 0x119   : > { %v445_v44 = vsel %vm444_vm0, %v443_v38, %v441_v0 }
 0x11c   : > { %918 = vset.pattern.permute.xlu2 %v940_v22 }
 0x11e   : > { %v408_v27 = vpop.permute.xlu1 %407  ;;  %v402_v32 = vpop.permute.xlu2 %401 }
 0x11f   : > { %v447_v36 = vperm.slane %v402_v32, %v442_v34  ;;  %v450_v39 = vperm.slane %v408_v27, %v442_v34 }
 0x121   : > { %v448_v40 = vsel %vm444_vm0, %v447_v36, %v446_v16 }
 0x122   : > { %v468_v48 = vsel %vm467_vm1, %v448_v40, %v445_v44 }
 0x125   : > { %v405_v30 = vpop.permute.xlu0 %404 }
 0x126   : > { %v414_v35 = vpop.permute.xlu1 %413  ;;  %v449_v37 = vperm.slane %v405_v30, %v1052_v31  ;;  %v426_v49 = vpop.permute.xlu2 %425 }
 0x127   : > { %v453_v45 = vperm.slane %v414_v35, %v442_v34  ;;  %v459_v56 = vperm.slane %v426_v49, %v442_v34 }
 0x128   : > { %v451_v41 = vsel %vm444_vm0, %v450_v39, %v449_v37 }
 0x129   : > { %v470_v51 = vsel %vm469_vm2, %v451_v41, %v468_v48  ;;  %v454_v55 = vsel %vm444_vm0, %v453_v45, %v452_v50  ;;  %v460_v63 = vsel %vm444_vm0, %v459_v56, %v458_v58 }
 0x12a   : > { %v472_v57 = vsel %vm471_vm3, %v454_v55, %v470_v51 }
 0x12d   : > { %v420_v33 = vpop.permute.xlu0 %419 }
 0x12e   : > { %v456_v42 = vperm.slane %v420_v33, %v442_v34 }
 0x130   : > { %v457_v52 = vsel %vm444_vm0, %v456_v42, %v455_v47  ;;  %v923_v47 = vld [vmem:[%s1137_s4] ss:$0 sm:$0xff] }
 0x131   : > { %v474_v59 = vsel %vm473_vm4, %v457_v52, %v472_v57 }
 0x132   : > { %v476_v7 = vsel %vm475_vm5, %v460_v63, %v474_v59 }
 0x135   : > { %v429_v43 = vpop.permute.xlu0 %428 }
 0x136   : > { %v432_v46 = vpop.permute.xlu1 %431  ;;  %v461_v54 = vperm.slane %v429_v43, %v1052_v31  ;;  %v515_v14 = vpop.permute.xlu2 %514 }
 0x137   : > { %v462_v53 = vperm.slane %v432_v46, %v442_v34 }
 0x139   : > { %v463_v60 = vsel %vm444_vm0, %v462_v53, %v461_v54 }
 0x13a   : > { %v478_v11 = vsel %vm477_vm6, %v463_v60, %v476_v7 }
 0x13d   : > { %v438_v61 = vpop.permute.xlu0 %437 }
 0x13e   : > { %v465_v6 = vperm.slane %v438_v61, %v442_v34  ;;  %v522_v15 = vpop.permute.xlu2 %521 }
 0x140   : > { %v466_v8 = vsel %vm444_vm0, %v465_v6, %v464_v62 }
 0x141   : > { %v480_v12 = vsel %vm479_vm7, %v466_v8, %v478_v11 }
 0x142   : > { %v483_v13 = vsel %vm482_vm8, %v480_v12, 0.0 }
 0x143   : > { %484 = vadd.xlane.f32.xlu1 %v483_v13 }
 0x146   : > { %v536_v18 = vpop.permute.xlu2 %535  ;;  %v578_v19 = vpop.permute.xlu1 %577 }
 0x14d   : > { %v543_v20 = vpop.permute.xlu0 %542 }
 0x14e   : > { %v550_v21 = vpop.permute.xlu2 %549 }
 0x155   : > { %v564_v27 = vpop.permute.xlu0 %563 }
 0x156   : > { %v571_v32 = vpop.permute.xlu2 %570 }
 0x15d   : > { %v585_v37 = vpop.permute.xlu0 %584 }
 0x15e   : > { %v592_v36 = vpop.permute.xlu2 %591 }
 0x1b6   : > { %v485_v24 = vpop.xlane.xlu1 %484 }
 0x1b7   : > { %v496_v25 = vadd.f32 %v1037_v3, %v485_v24 }
 0x1b9   : > { %v497_v26 = vmax.f32 %v496_v25, 0.0 }
 0x1bb   : > { %v631_v28 = vmul.f32 %v515_v14, %v497_v26  ;;  %v630_v29 = vmul.f32 %v1044_v17, %v497_v26  ;;  %v638_v30 = vmul.f32 %v564_v27, %v497_v26  ;;  %v633_v33 = vmul.f32 %v1048_v23, %v497_v26  ;;  %v606_v17 = vpop.permute.xlu2 %605  ;;  %v599_v23 = vpop.permute.xlu0 %598 }
 0x1bc   : > { %v639_v34 = vmul.f32 %v571_v32, %v497_v26  ;;  %v632_v35 = vmul.f32 %v522_v15, %v497_v26  ;;  %v642_v3 = vmul.f32 %v592_v36, %v497_v26  ;;  %v640_v16 = vmul.f32 %v578_v19, %v497_v26 }
 0x1bd   : > { %666 = vperm.xlu0 %917, %v631_v28   ;;  %663 = vperm.xlu1 %916, %v630_v29   ;;  %v641_v38 = vmul.f32 %v585_v37, %v497_v26  ;;  %v636_v39 = vmul.f32 %v550_v21, %v497_v26  ;;  %v634_v0 = vmul.f32 %v536_v18, %v497_v26 }
 0x1be   : > { %687 = vperm.xlu2 %918, %v638_v30   ;;  %v635_v40 = vmul.f32 %v543_v20, %v497_v26  ;;  %v643_v43 = vmul.f32 %v599_v23, %v497_v26  ;;  %v644_v44 = vmul.f32 %v606_v17, %v497_v26 }
 0x1c3   : > { %v613_v41 = vpop.permute.xlu2 %612  ;;  %v557_v45 = vpop.permute.xlu0 %556 }
 0x1c4   : > { %v645_v42 = vmul.f32 %v613_v41, %v497_v26  ;;  %v637_v46 = vmul.f32 %v557_v45, %v497_v26 }
 0x1c5   : > { %672 = vperm.xlu0 %917, %v633_v33   ;;  %690 = vperm.xlu1 %916, %v639_v34  }
 0x1c6   : > { %669 = vperm.xlu2 %918, %v632_v35  }
 0x1cd   : > { %699 = vperm.xlu0 %917, %v642_v3   ;;  %693 = vperm.xlu1 %916, %v640_v16  }
 0x1ce   : > { %696 = vperm.xlu2 %918, %v641_v38  }
 0x1d5   : > { %681 = vperm.xlu0 %917, %v636_v39   ;;  %675 = vperm.xlu1 %916, %v634_v0  }
 0x1d6   : > { %678 = vperm.xlu2 %918, %v635_v40  }
 0x1dd   : > { %708 = vperm.xlu0 %917, %v645_v42   ;;  %702 = vperm.xlu1 %916, %v643_v43  }
 0x1de   : > { %705 = vperm.xlu2 %918, %v644_v44  }
 0x1e5   : > { %684 = vperm.xlu1 %916, %v637_v46   ;;  %919 = vset.pattern.permute.xlu0 %v980_v1 }
 0x1ed   : > { %756 = vperm.xlu0 %919, %v923_v47  }
 0x1f5   : > { %920 = vset.pattern.permute.xlu0 %v988_v2 }
 0x1fd   : > { %762 = vperm.xlu0 %920, %v923_v47  }
 0x205   : > { %921 = vset.pattern.permute.xlu0 %v940_v22 }
 0x218   : > { %v688_v48 = vpop.permute.xlu2 %687 }
 0x219   : > { %v718_v2 = vperm.slane %v688_v48, %v1052_v31 }
 0x220   : > { %v670_v51 = vpop.permute.xlu2 %669 }
 0x221   : > { %v712_v13 = vperm.slane %v670_v51, %v1052_v31 }
 0x228   : > { %v697_v54 = vpop.permute.xlu2 %696 }
 0x229   : > { %v721_v22 = vperm.slane %v697_v54, %v1052_v31 }
 0x22f   : > { %v664_v49 = vpop.permute.xlu1 %663  ;;  %v667_v50 = vpop.permute.xlu0 %666 }
 0x230   : > { %v679_v1 = vpop.permute.xlu2 %678  ;;  %v710_v61 = vperm.slane %v664_v49, %v1052_v31  ;;  %v711_v62 = vperm.slane %v667_v50, %v1052_v31 }
 0x231   : > { %v715_v32 = vperm.slane %v679_v1, %v1052_v31 }
 0x232   : > { %v726_v7 = vsel %vm467_vm1, %v711_v62, %v710_v61 }
 0x233   : > { %v727_v24 = vsel %vm469_vm2, %v712_v13, %v726_v7 }
 0x237   : > { %v691_v52 = vpop.permute.xlu1 %690  ;;  %v673_v53 = vpop.permute.xlu0 %672 }
 0x238   : > { %v719_v57 = vperm.slane %v691_v52, %v1052_v31  ;;  %v706_v8 = vpop.permute.xlu2 %705  ;;  %v713_v11 = vperm.slane %v673_v53, %v1052_v31 }
 0x239   : > { %v724_v21 = vperm.slane %v706_v8, %v1052_v31 }
 0x23a   : > { %v733_v63 = vsel %vm467_vm1, %v719_v57, %v718_v2  ;;  %v728_v26 = vsel %vm471_vm3, %v713_v11, %v727_v24 }
 0x23f   : > { %v694_v55 = vpop.permute.xlu1 %693  ;;  %v700_v56 = vpop.permute.xlu0 %699 }
 0x240   : > { %v720_v58 = vperm.slane %v694_v55, %v1052_v31  ;;  %v722_v14 = vperm.slane %v700_v56, %v1052_v31 }
 0x242   : > { %v734_v6 = vsel %vm469_vm2, %v720_v58, %v733_v63 }
 0x243   : > { %v735_v12 = vsel %vm471_vm3, %v721_v22, %v734_v6 }
 0x244   : > { %v736_v25 = vsel %vm473_vm4, %v722_v14, %v735_v12 }
 0x247   : > { %v676_v59 = vpop.permute.xlu1 %675  ;;  %v682_v60 = vpop.permute.xlu0 %681 }
 0x248   : > { %v714_v15 = vperm.slane %v676_v59, %v1052_v31  ;;  %v716_v36 = vperm.slane %v682_v60, %v1052_v31 }
 0x24a   : > { %v729_v29 = vsel %vm473_vm4, %v714_v15, %v728_v26 }
 0x24b   : > { %v730_v35 = vsel %vm475_vm5, %v715_v32, %v729_v29 }
 0x24c   : > { %v731_v16 = vsel %vm477_vm6, %v716_v36, %v730_v35 }
 0x24f   : > { %v703_v18 = vpop.permute.xlu1 %702  ;;  %v709_v19 = vpop.permute.xlu0 %708 }
 0x250   : > { %v723_v20 = vperm.slane %v703_v18, %v1052_v31  ;;  %v725_v28 = vperm.slane %v709_v19, %v1052_v31 }
 0x252   : > { %v737_v27 = vsel %vm475_vm5, %v723_v20, %v736_v25 }
 0x253   : > { %v738_v30 = vsel %vm477_vm6, %v724_v21, %v737_v27 }
 0x254   : > { %v739_v33 = vsel %vm479_vm7, %v725_v28, %v738_v30 }
 0x255   : > { %v746_v34 = vsel %vm742_vm9, %v739_v33, 0.0 }
 0x256   : > { %747 = vadd.xlane.f32.xlu1 %v746_v34 }
 0x257   : > { %v685_v37 = vpop.permute.xlu1 %684 }
 0x258   : > { %v717_v3 = vperm.slane %v685_v37, %v1052_v31 }
 0x25a   : > { %v732_v38 = vsel %vm479_vm7, %v717_v3, %v731_v16 }
 0x25b   : > { %v743_v17 = vsel %vm742_vm9, %v732_v38, 0.0 }
 0x25c   : > { %744 = vadd.xlane.f32.xlu2 %v743_v17 }
 0x25f   : > { %v757_v39 = vpop.permute.xlu0 %756 }
 0x26f   : > { %v763_v0 = vpop.permute.xlu0 %762 }
 0x2c9   : > { %v748_v40 = vpop.xlane.xlu1 %747 }
 0x2ca   : > { %v767_v23 = vadd.f32 %v763_v0, %v748_v40 }
 0x2cc   : > { %v889_v41 = vmul.f32 -1.442695, %v767_v23 }
 0x2ce   : > { %924 = vpow2.f32 %v889_v41 }
 0x2cf   : > { %v745_v42 = vpop.xlane.xlu2 %744 }
 0x2d0   : > { %v766_v43 = vadd.f32 %v757_v39, %v745_v42 }
 0x2d2   : > { %v888_v44 = vmul.f32 -1.442695, %v766_v43 }
 0x2d4   : > { %v925_v45 = vpop.eup %924  ;;  %926 = vpow2.f32 %v888_v44 }
 0x2d5   : > { %v775_v46 = vadd.f32 1.0, %v925_v45 }
 0x2d7   : > { %928 = vrcp.f32 %v775_v46  ;;  %v802_v51 = vand.u32 2147483648, %v775_v46  ;;  %v800_v53 = vand.u32 2147483647, %v775_v46  ;;  %vm796_vm11 = vweird.f32 %v775_v46 }
 0x2d9   : > { %v803_v1 = vor.u32 1.1754944e-38, %v802_v51  ;;  %vm801_vm13 = vcmp.eq.f32.partialorder %v800_v53, 8.507059e+37 }
 0x2da   : > { %v927_v31 = vpop.eup %926 }
 0x2db   : > { %v774_v47 = vadd.f32 1.0, %v927_v31 }
 0x2dd   : > { %v929_v48 = vpop.eup %928  ;;  %930 = vrcp.f32 %v774_v47  ;;  %v787_v60 = vand.u32 2147483648, %v774_v47  ;;  %v785_v61 = vand.u32 2147483647, %v774_v47  ;;  %vm781_vm15 = vweird.f32 %v774_v47 }
 0x2de   : > { %v792_v49 = vmul.f32 %v929_v48, %v775_v46  ;;  %vm797_vm10 = vweird.f32 %v929_v48 }
 0x2df   : > { %vm798_vm12 = vmor %vm796_vm11, %vm797_vm10  ;;  %v788_v63 = vor.u32 1.1754944e-38, %v787_v60  ;;  %vm786_vm1 = vcmp.eq.f32.partialorder %v785_v61, 8.507059e+37 }
 0x2e0   : > { %v793_v50 = vsub.f32 1.0, %v792_v49 }
 0x2e2   : > { %v794_v52 = vmul.f32 %v929_v48, %v793_v50 }
 0x2e3   : > { %v931_v54 = vpop.eup %930 }
 0x2e4   : > { %v795_v55 = vadd.f32 %v929_v48, %v794_v52  ;;  %v777_v56 = vmul.f32 %v931_v54, %v774_v47  ;;  %vm782_vm14 = vweird.f32 %v931_v54 }
 0x2e5   : > { %vm783_vm0 = vmor %vm781_vm15, %vm782_vm14 }
 0x2e6   : > { %v799_v57 = vsel %vm798_vm12, %v929_v48, %v795_v55  ;;  %v778_v58 = vsub.f32 1.0, %v777_v56 }
 0x2e7   : > { %v804_v59 = vsel %vm801_vm13, %v803_v1, %v799_v57 }
 0x2e8   : > { %813 = vperm.xlu2 %918, %v804_v59   ;;  %v779_v2 = vmul.f32 %v931_v54, %v778_v58 }
 0x2ea   : > { %v780_v62 = vadd.f32 %v931_v54, %v779_v2 }
 0x2ec   : > { %v784_v6 = vsel %vm783_vm0, %v931_v54, %v780_v62 }
 0x2ed   : > { %v789_v22 = vsel %vm786_vm1, %v788_v63, %v784_v6 }
 0x2ee   : > { %808 = vperm.xlu0 %921, %v789_v22  }
 0x342   : > { %v814_v7 = vpop.permute.xlu2 %813 }
 0x343   : > { %v818_v8 = vmul.f32 %v814_v7, %v1005_v9  ;;  %v819_v11 = vmul.f32 %v814_v7, %v1007_v10 }
 0x345   : > { %822 = vst [vmem:[%s224_s11 + $0x10] sm:$0xff] %v818_v8 }
 0x346   : > { %823 = vst [vmem:[%s224_s11 + $0x18] sm:$0xff] %v819_v11 }
 0x360   : > { %v809_v12 = vpop.permute.xlu0 %808 }
 0x361   : > { %v816_v13 = vmul.f32 %v809_v12, %v998_v4  ;;  %v817_v14 = vmul.f32 %v809_v12, %v1000_v5 }
 0x363   : > { %820 = vst [vmem:[%s224_s11] sm:$0xff] %v816_v13 }
 0x364   : > { %821 = vst [vmem:[%s224_s11 + $0x8] sm:$0xff] %v817_v14 }
 0x365 PF: > { %s15_s18 = sadd.s32 1, %s938_s18  }
 0x366   : > { %p12_p4 = scmp.ge.s32.totalorder %s15_s18, 4  }
 0x368   :  { %14 = sbr.rel (!%p12_p4) target bundleno = 1 (0x1), region = 70 }

</bundles_post_ra>
